<compile_context>
chip_gen: v6e
topology: v6e:2x2x1
jax: 0.10.0
libtpu: 0.0.40
codegen_flags: <defaults>
</compile_context>

<pallas_src>
import functools
import math

import jax
import jax.numpy as jnp
from jax.experimental import pallas as pl
from jax.experimental.pallas import tpu as pltpu

LANE = 128      # vreg lane width (last dim)
SUBLANE = 8     # vreg sublane count (second-to-last dim, f32)


def _round_up(x, m):
    return (x + m - 1) // m * m


def _mlp_kernel(n_layers, compute_dtype, *refs):
    """Fused MLP forward over one batch tile.

    refs = (x_ref, w0, b0, w1, b1, ..., w_{L-1}, b_{L-1}, out_ref)

    Matmuls use `compute_dtype` (bf16 by default) operands with f32 MXU
    accumulation.  Bias add / ReLU / sigmoid stay in f32.
    """
    x_ref = refs[0]
    out_ref = refs[-1]
    param_refs = refs[1:-1]
    assert len(param_refs) == 2 * n_layers

    h = x_ref[...]
    if h.dtype != compute_dtype:
        h = h.astype(compute_dtype)

    for i in range(n_layers):
        w = param_refs[2 * i][...]          # (in_p, out_p), compute_dtype
        b = param_refs[2 * i + 1][...]      # (1, out_p), f32
        acc = jnp.dot(h, w, preferred_element_type=jnp.float32) + b
        if i < n_layers - 1:
            acc = jnp.maximum(acc, 0.0)                       # ReLU (f32, VPU)
            h = acc.astype(compute_dtype) if compute_dtype != jnp.float32 else acc
        else:
            # Sigmoid epilogue: exp (EUP) + approx reciprocal (EUP) keeps the
            # divide off the VPU.
            e = jnp.exp(-acc)
            y = pl.reciprocal(1.0 + e, approx=True)
            out_ref[...] = y.astype(out_ref.dtype)


def prepare_params(params, compute_dtype=jnp.bfloat16):
    """One-time preprocessing: pad every feature dim to 128 lanes and cast
    weights to the compute dtype.  Done once at init so per-call forward does
    not re-materialize padded parameter copies in HBM.

    params: list of (W, b) with W: (in_f, out_f), b: (1, out_f) or (out_f,).
    Returns (flat_padded_arrays, dims, padded_dims).
    """
    dims = [params[0][0].shape[0]] + [w.shape[1] for (w, _) in params]
    pdims = [_round_up(d, LANE) for d in dims]

    flat = []
    for i, (w, b) in enumerate(params):
        fi, fo = w.shape
        pfi, pfo = pdims[i], pdims[i + 1]
        w_p = jnp.zeros((pfi, pfo), compute_dtype).at[:fi, :fo].set(
            w.astype(compute_dtype))
        b_p = jnp.zeros((1, pfo), jnp.float32).at[:, :fo].set(
            b.reshape(1, fo).astype(jnp.float32))
        flat += [w_p, b_p]
    return tuple(flat), tuple(dims), tuple(pdims)


def _vmem_cap_bytes():
    """Generation-aware VMEM cap with ~15% headroom for Mosaic scratch."""
    try:
        cap = int(pltpu.get_tpu_info().vmem_capacity_bytes)
    except Exception:
        cap = 64 << 20   # conservative fallback: v7x per-TC VMEM
    return int(cap * 0.85)


def mlp_forward(x, prepared, *, compute_dtype=jnp.bfloat16,
                out_dtype=jnp.bfloat16, batch_tile=512):
    """x: (batch, in_f) f32.  prepared: output of prepare_params()."""
    flat, dims, pdims = prepared
    n_layers = len(flat) // 2
    batch, in_f = x.shape
    assert in_f == dims[0], "x feature dim does not match params"
    out_f = dims[-1]

    # Row alignment: 16 when 16-bit tiles are in flight (bf16 packs 2 rows /
    # sublane), otherwise 8.
    row_align = 16 if (jnp.dtype(compute_dtype).itemsize == 2
                       or jnp.dtype(out_dtype).itemsize == 2) else SUBLANE

    # ---- Batch tile: as large as the VMEM budget allows (primary knob). ----
    tb = min(batch_tile, _round_up(batch, row_align))
    tb = _round_up(tb, row_align)

    cap = _vmem_cap_bytes()
    param_bytes = sum(a.size * a.dtype.itemsize for a in flat)

    def needed_bytes(tb_):
        # params (worst case double-buffered fallback) + double-buffered x/out
        # tiles + headroom for f32 intermediates.
        io = 2 * (tb_ * pdims[0] * 4
                  + tb_ * pdims[-1] * jnp.dtype(out_dtype).itemsize)
        scratch = 4 * tb_ * max(pdims) * 4
        return 2 * param_bytes + io + scratch

    while tb > row_align and needed_bytes(tb) > cap:
        tb = _round_up(tb // 2, row_align)

    n_tiles = pl.cdiv(batch, tb)
    # v7x has 2 TCs: prefer an even tile count (>=2) so the "parallel" axis
    # shards evenly.  (With n_tiles == 1, e.g. the tiny demo, we do NOT pad a
    # whole dead tile -- that would just penalize single-TC v5e/v6e.)
    if n_tiles > 1 and n_tiles % 2 == 1:
        tb = _round_up(pl.cdiv(batch, n_tiles + 1), row_align)
        n_tiles = pl.cdiv(batch, tb)
    pb = n_tiles * tb

    # ---- x: pad + cast only when needed (keeps common aligned case copy-free). ----
    needs_pad = (pb != batch) or (pdims[0] != in_f)
    if needs_pad:
        x_in = jnp.zeros((pb, pdims[0]), compute_dtype).at[:batch, :in_f].set(
            x.astype(compute_dtype))
    else:
        x_in = x   # streamed as-is; cast to compute dtype inside the kernel

    vmem_limit = int(min(cap, max(needed_bytes(tb) + (4 << 20), 32 << 20)))

    # ---- Cost hint for XLA scheduling around the custom call. ----
    flops = 2 * pb * sum(pdims[i] * pdims[i + 1] for i in range(n_layers))
    cost = pl.CostEstimate(
        flops=int(flops),
        transcendentals=int(pb * pdims[-1]),
        bytes_accessed=int(x_in.size * x_in.dtype.itemsize
                           + param_bytes
                           + pb * pdims[-1] * jnp.dtype(out_dtype).itemsize),
    )

    kernel = functools.partial(_mlp_kernel, n_layers, compute_dtype)

    def build(single_buffer_params):
        in_specs = [pl.BlockSpec((tb, pdims[0]), lambda i: (i, 0))]
        for li in range(n_layers):
            pfi, pfo = pdims[li], pdims[li + 1]
            # Constant index_map: weights/biases stay VMEM-resident across
            # tiles; Buffered(1) drops their pointless double-buffering.
            kw = dict(pipeline_mode=pl.Buffered(1)) if single_buffer_params else {}
            in_specs.append(pl.BlockSpec((pfi, pfo), lambda i: (0, 0), **kw))
            in_specs.append(pl.BlockSpec((1, pfo), lambda i: (0, 0), **kw))
        out_specs = pl.BlockSpec((tb, pdims[-1]), lambda i: (i, 0))
        return pl.pallas_call(
            kernel,
            out_shape=jax.ShapeDtypeStruct((pb, pdims[-1]), out_dtype),
            grid_spec=pltpu.PrefetchScalarGridSpec(
                num_scalar_prefetch=0,
                grid=(n_tiles,),
                in_specs=in_specs,
                out_specs=out_specs,
            ),
            compiler_params=pltpu.CompilerParams(
                dimension_semantics=("parallel",),
                vmem_limit_bytes=vmem_limit,
            ),
            cost_estimate=cost,
        )

    try:
        out_p = jax.block_until_ready(build(True)(x_in, *flat))
    except Exception:
        # pl.Buffered(1) not accepted by this jax build / lowering: fall back
        # to the known-good default (double-buffered) weight specs.
        out_p = jax.block_until_ready(build(False)(x_in, *flat))

    # Un-pad (slice) outside the kernel.
    return out_p[:batch, :out_f]


def init_params(key, input_size, hidden_size, output_size, depth):
    """Deterministic init matching PyTorch nn.Linear default bound 1/sqrt(fan_in)."""
    dims = [input_size] + [hidden_size] * depth + [output_size]
    params = []
    for i in range(len(dims) - 1):
        fan_in, fan_out = dims[i], dims[i + 1]
        key, kw, kb = jax.random.split(key, 3)
        bound = 1.0 / math.sqrt(fan_in)
        w = jax.random.uniform(kw, (fan_in, fan_out), jnp.float32, -bound, bound)
        b = jax.random.uniform(kb, (1, fan_out), jnp.float32, -bound, bound)
        params.append((w, b))
    return params


def reference_forward_f32(x, params):
    """Pure-f32 JAX reference of the module's forward pass."""
    h = x
    n = len(params)
    for i, (w, b) in enumerate(params):
        h = h @ w + b
        if i < n - 1:
            h = jnp.maximum(h, 0.0)
    return jax.nn.sigmoid(h)


def reference_forward_matched(x, params, compute_dtype=jnp.bfloat16):
    """Reference with the same mixed precision as the kernel (bf16 dot, f32 acc)."""
    h = x.astype(compute_dtype)
    n = len(params)
    acc = None
    for i, (w, b) in enumerate(params):
        acc = jnp.dot(h, w.astype(compute_dtype),
                      preferred_element_type=jnp.float32) + b
        if i < n - 1:
            h = jnp.maximum(acc, 0.0).astype(compute_dtype)
    return jax.nn.sigmoid(acc)


if __name__ == "__main__":
    # Small shapes consistent with the module's forward:
    batch = 8
    input_size = 32
    hidden_size = 64
    output_size = 16
    depth = 3  # -> 4 Linear layers total

    key = jax.random.PRNGKey(0)
    key, kx = jax.random.split(key)
    x = jax.random.normal(kx, (batch, input_size), jnp.float32)

    params = init_params(key, input_size, hidden_size, output_size, depth)
    prepared = prepare_params(params)          # one-time padding / casting

    out = mlp_forward(x, prepared)
    out = jax.block_until_ready(out)

    assert out.shape == (batch, output_size)

    out_f32 = out.astype(jnp.float32)
    ref_matched = reference_forward_matched(x, params)
    ref_f32 = reference_forward_f32(x, params)
    assert jnp.allclose(out_f32, ref_matched, atol=1e-2, rtol=1e-2), \
        "mismatch vs matched-precision JAX reference"
    assert jnp.allclose(out_f32, ref_f32, atol=5e-2, rtol=5e-2), \
        "mismatch vs f32 JAX reference"

    print("KERNEL_OK")
</pallas_src>

<mosaic_0001>
module attributes {stable_mosaic.version = 11 : i64} {
  func.func @_mlp_kernel(%arg0: i32, %arg1: memref<16x128xbf16, #tpu.memory_space<vmem>>, %arg2: memref<128x128xbf16, #tpu.memory_space<vmem>>, %arg3: memref<1x128xf32, #tpu.memory_space<vmem>>, %arg4: memref<128x128xbf16, #tpu.memory_space<vmem>>, %arg5: memref<1x128xf32, #tpu.memory_space<vmem>>, %arg6: memref<128x128xbf16, #tpu.memory_space<vmem>>, %arg7: memref<1x128xf32, #tpu.memory_space<vmem>>, %arg8: memref<128x128xbf16, #tpu.memory_space<vmem>>, %arg9: memref<1x128xf32, #tpu.memory_space<vmem>>, %arg10: memref<16x128xbf16, #tpu.memory_space<vmem>>) attributes {dimension_semantics = [#tpu.dimension_semantics<parallel>], iteration_bounds = array<i64: 1>, scalar_prefetch = 0 : i64, scratch_operands = 0 : i64, tpu.core_type = #tpu.core_type<tc>, window_params = [{transform_indices = @transform_0, window_bounds = array<i64: 16, 128>}, {pipeline_mode = #tpu.pipeline_mode<synchronous>, transform_indices = @transform_1, window_bounds = array<i64: 128, 128>}, {pipeline_mode = #tpu.pipeline_mode<synchronous>, transform_indices = @transform_2, window_bounds = array<i64: 1, 128>}, {pipeline_mode = #tpu.pipeline_mode<synchronous>, transform_indices = @transform_3, window_bounds = array<i64: 128, 128>}, {pipeline_mode = #tpu.pipeline_mode<synchronous>, transform_indices = @transform_4, window_bounds = array<i64: 1, 128>}, {pipeline_mode = #tpu.pipeline_mode<synchronous>, transform_indices = @transform_5, window_bounds = array<i64: 128, 128>}, {pipeline_mode = #tpu.pipeline_mode<synchronous>, transform_indices = @transform_6, window_bounds = array<i64: 1, 128>}, {pipeline_mode = #tpu.pipeline_mode<synchronous>, transform_indices = @transform_7, window_bounds = array<i64: 128, 128>}, {pipeline_mode = #tpu.pipeline_mode<synchronous>, transform_indices = @transform_8, window_bounds = array<i64: 1, 128>}, {transform_indices = @transform_9, window_bounds = array<i64: 16, 128>}]} {
    %c0 = arith.constant 0 : index
    %c0_0 = arith.constant 0 : index
    %0 = vector.load %arg1[%c0, %c0_0] : memref<16x128xbf16, #tpu.memory_space<vmem>>, vector<16x128xbf16>
    %c0_1 = arith.constant 0 : index
    %c0_2 = arith.constant 0 : index
    %1 = vector.load %arg2[%c0_1, %c0_2] : memref<128x128xbf16, #tpu.memory_space<vmem>>, vector<128x128xbf16>
    %c0_3 = arith.constant 0 : index
    %c0_4 = arith.constant 0 : index
    %2 = vector.load %arg3[%c0_3, %c0_4] : memref<1x128xf32, #tpu.memory_space<vmem>>, vector<1x128xf32>
    %cst = arith.constant dense<0.000000e+00> : vector<16x128xf32>
    %3 = tpu.matmul %0, %1, %cst {dimension_numbers = #tpu.dot_dimension_numbers<[1], [0], [0], [1], [0, 0, 1, 1], [], []>} : vector<16x128xbf16>, vector<128x128xbf16>, vector<16x128xf32> -> vector<16x128xf32>
    %4 = vector.broadcast %2 : vector<1x128xf32> to vector<16x128xf32>
    %5 = arith.addf %3, %4 : vector<16x128xf32>
    %cst_5 = arith.constant 0.000000e+00 : f32
    %6 = vector.broadcast %cst_5 : f32 to vector<16x128xf32>
    %7 = arith.maximumf %5, %6 : vector<16x128xf32>
    %8 = arith.truncf %7 : vector<16x128xf32> to vector<16x128xbf16>
    %c0_6 = arith.constant 0 : index
    %c0_7 = arith.constant 0 : index
    %9 = vector.load %arg4[%c0_6, %c0_7] : memref<128x128xbf16, #tpu.memory_space<vmem>>, vector<128x128xbf16>
    %c0_8 = arith.constant 0 : index
    %c0_9 = arith.constant 0 : index
    %10 = vector.load %arg5[%c0_8, %c0_9] : memref<1x128xf32, #tpu.memory_space<vmem>>, vector<1x128xf32>
    %cst_10 = arith.constant dense<0.000000e+00> : vector<16x128xf32>
    %11 = tpu.matmul %8, %9, %cst_10 {dimension_numbers = #tpu.dot_dimension_numbers<[1], [0], [0], [1], [0, 0, 1, 1], [], []>} : vector<16x128xbf16>, vector<128x128xbf16>, vector<16x128xf32> -> vector<16x128xf32>
    %12 = vector.broadcast %10 : vector<1x128xf32> to vector<16x128xf32>
    %13 = arith.addf %11, %12 : vector<16x128xf32>
    %cst_11 = arith.constant 0.000000e+00 : f32
    %14 = vector.broadcast %cst_11 : f32 to vector<16x128xf32>
    %15 = arith.maximumf %13, %14 : vector<16x128xf32>
    %16 = arith.truncf %15 : vector<16x128xf32> to vector<16x128xbf16>
    %c0_12 = arith.constant 0 : index
    %c0_13 = arith.constant 0 : index
    %17 = vector.load %arg6[%c0_12, %c0_13] : memref<128x128xbf16, #tpu.memory_space<vmem>>, vector<128x128xbf16>
    %c0_14 = arith.constant 0 : index
    %c0_15 = arith.constant 0 : index
    %18 = vector.load %arg7[%c0_14, %c0_15] : memref<1x128xf32, #tpu.memory_space<vmem>>, vector<1x128xf32>
    %cst_16 = arith.constant dense<0.000000e+00> : vector<16x128xf32>
    %19 = tpu.matmul %16, %17, %cst_16 {dimension_numbers = #tpu.dot_dimension_numbers<[1], [0], [0], [1], [0, 0, 1, 1], [], []>} : vector<16x128xbf16>, vector<128x128xbf16>, vector<16x128xf32> -> vector<16x128xf32>
    %20 = vector.broadcast %18 : vector<1x128xf32> to vector<16x128xf32>
    %21 = arith.addf %19, %20 : vector<16x128xf32>
    %cst_17 = arith.constant 0.000000e+00 : f32
    %22 = vector.broadcast %cst_17 : f32 to vector<16x128xf32>
    %23 = arith.maximumf %21, %22 : vector<16x128xf32>
    %24 = arith.truncf %23 : vector<16x128xf32> to vector<16x128xbf16>
    %c0_18 = arith.constant 0 : index
    %c0_19 = arith.constant 0 : index
    %25 = vector.load %arg8[%c0_18, %c0_19] : memref<128x128xbf16, #tpu.memory_space<vmem>>, vector<128x128xbf16>
    %c0_20 = arith.constant 0 : index
    %c0_21 = arith.constant 0 : index
    %26 = vector.load %arg9[%c0_20, %c0_21] : memref<1x128xf32, #tpu.memory_space<vmem>>, vector<1x128xf32>
    %cst_22 = arith.constant dense<0.000000e+00> : vector<16x128xf32>
    %27 = tpu.matmul %24, %25, %cst_22 {dimension_numbers = #tpu.dot_dimension_numbers<[1], [0], [0], [1], [0, 0, 1, 1], [], []>} : vector<16x128xbf16>, vector<128x128xbf16>, vector<16x128xf32> -> vector<16x128xf32>
    %28 = vector.broadcast %26 : vector<1x128xf32> to vector<16x128xf32>
    %29 = arith.addf %27, %28 : vector<16x128xf32>
    %cst_23 = arith.constant 0.000000e+00 : f32
    %30 = vector.broadcast %cst_23 : f32 to vector<16x128xf32>
    %31 = arith.subf %30, %29 : vector<16x128xf32>
    %32 = math.exp %31 : vector<16x128xf32>
    %cst_24 = arith.constant 1.000000e+00 : f32
    %33 = vector.broadcast %cst_24 : f32 to vector<16x128xf32>
    %34 = arith.addf %33, %32 : vector<16x128xf32>
    %35 = tpu.reciprocal %34 {approx = true} : vector<16x128xf32> -> vector<16x128xf32>
    %36 = arith.truncf %35 : vector<16x128xf32> to vector<16x128xbf16>
    %c0_25 = arith.constant 0 : index
    %c0_26 = arith.constant 0 : index
    %37 = vector.load %arg10[%c0_25, %c0_26] : memref<16x128xbf16, #tpu.memory_space<vmem>>, vector<16x128xbf16>
    tpu.vector_store %arg10[%c0_25, %c0_26], %36 {strides = array<i32>} : memref<16x128xbf16, #tpu.memory_space<vmem>>, vector<16x128xbf16>,
    return
  }
  func.func @transform_0(%arg0: i32) -> (i32, i32) {
    %c0_i32 = arith.constant 0 : i32
    %c0_i32_0 = arith.constant 0 : i32
    return %arg0, %c0_i32 : i32, i32
  }
  func.func @transform_1(%arg0: i32) -> (i32, i32) {
    %c0_i32 = arith.constant 0 : i32
    %c0_i32_0 = arith.constant 0 : i32
    %c0_i32_1 = arith.constant 0 : i32
    return %c0_i32, %c0_i32_0 : i32, i32
  }
  func.func @transform_2(%arg0: i32) -> (i32, i32) {
    %c0_i32 = arith.constant 0 : i32
    %c0_i32_0 = arith.constant 0 : i32
    %c0_i32_1 = arith.constant 0 : i32
    return %c0_i32, %c0_i32_0 : i32, i32
  }
  func.func @transform_3(%arg0: i32) -> (i32, i32) {
    %c0_i32 = arith.constant 0 : i32
    %c0_i32_0 = arith.constant 0 : i32
    %c0_i32_1 = arith.constant 0 : i32
    return %c0_i32, %c0_i32_0 : i32, i32
  }
  func.func @transform_4(%arg0: i32) -> (i32, i32) {
    %c0_i32 = arith.constant 0 : i32
    %c0_i32_0 = arith.constant 0 : i32
    %c0_i32_1 = arith.constant 0 : i32
    return %c0_i32, %c0_i32_0 : i32, i32
  }
  func.func @transform_5(%arg0: i32) -> (i32, i32) {
    %c0_i32 = arith.constant 0 : i32
    %c0_i32_0 = arith.constant 0 : i32
    %c0_i32_1 = arith.constant 0 : i32
    return %c0_i32, %c0_i32_0 : i32, i32
  }
  func.func @transform_6(%arg0: i32) -> (i32, i32) {
    %c0_i32 = arith.constant 0 : i32
    %c0_i32_0 = arith.constant 0 : i32
    %c0_i32_1 = arith.constant 0 : i32
    return %c0_i32, %c0_i32_0 : i32, i32
  }
  func.func @transform_7(%arg0: i32) -> (i32, i32) {
    %c0_i32 = arith.constant 0 : i32
    %c0_i32_0 = arith.constant 0 : i32
    %c0_i32_1 = arith.constant 0 : i32
    return %c0_i32, %c0_i32_0 : i32, i32
  }
  func.func @transform_8(%arg0: i32) -> (i32, i32) {
    %c0_i32 = arith.constant 0 : i32
    %c0_i32_0 = arith.constant 0 : i32
    %c0_i32_1 = arith.constant 0 : i32
    return %c0_i32, %c0_i32_0 : i32, i32
  }
  func.func @transform_9(%arg0: i32) -> (i32, i32) {
    %c0_i32 = arith.constant 0 : i32
    %c0_i32_0 = arith.constant 0 : i32
    return %arg0, %c0_i32 : i32, i32
  }
}

module attributes {stable_mosaic.version = 11 : i64} {
  func.func @_mlp_kernel(%arg0: i32, %arg1: memref<16x128xbf16, #tpu.memory_space<vmem>>, %arg2: memref<128x128xbf16, #tpu.memory_space<vmem>>, %arg3: memref<1x128xf32, #tpu.memory_space<vmem>>, %arg4: memref<128x128xbf16, #tpu.memory_space<vmem>>, %arg5: memref<1x128xf32, #tpu.memory_space<vmem>>, %arg6: memref<128x128xbf16, #tpu.memory_space<vmem>>, %arg7: memref<1x128xf32, #tpu.memory_space<vmem>>, %arg8: memref<128x128xbf16, #tpu.memory_space<vmem>>, %arg9: memref<1x128xf32, #tpu.memory_space<vmem>>, %arg10: memref<16x128xbf16, #tpu.memory_space<vmem>>) attributes {dimension_semantics = [#tpu.dimension_semantics<parallel>], iteration_bounds = array<i64: 1>, scalar_prefetch = 0 : i64, scratch_operands = 0 : i64, tpu.core_type = #tpu.core_type<tc>, window_params = [{transform_indices = @transform_0, window_bounds = array<i64: 16, 128>}, {pipeline_mode = #tpu.pipeline_mode<synchronous>, transform_indices = @transform_1, window_bounds = array<i64: 128, 128>}, {pipeline_mode = #tpu.pipeline_mode<synchronous>, transform_indices = @transform_2, window_bounds = array<i64: 1, 128>}, {pipeline_mode = #tpu.pipeline_mode<synchronous>, transform_indices = @transform_3, window_bounds = array<i64: 128, 128>}, {pipeline_mode = #tpu.pipeline_mode<synchronous>, transform_indices = @transform_4, window_bounds = array<i64: 1, 128>}, {pipeline_mode = #tpu.pipeline_mode<synchronous>, transform_indices = @transform_5, window_bounds = array<i64: 128, 128>}, {pipeline_mode = #tpu.pipeline_mode<synchronous>, transform_indices = @transform_6, window_bounds = array<i64: 1, 128>}, {pipeline_mode = #tpu.pipeline_mode<synchronous>, transform_indices = @transform_7, window_bounds = array<i64: 128, 128>}, {pipeline_mode = #tpu.pipeline_mode<synchronous>, transform_indices = @transform_8, window_bounds = array<i64: 1, 128>}, {transform_indices = @transform_9, window_bounds = array<i64: 16, 128>}]} {
    %c0 = arith.constant 0 : index
    %c0_0 = arith.constant 0 : index
    %0 = vector.load %arg1[%c0, %c0_0] : memref<16x128xbf16, #tpu.memory_space<vmem>>, vector<16x128xbf16>
    %c0_1 = arith.constant 0 : index
    %c0_2 = arith.constant 0 : index
    %1 = vector.load %arg2[%c0_1, %c0_2] : memref<128x128xbf16, #tpu.memory_space<vmem>>, vector<128x128xbf16>
    %c0_3 = arith.constant 0 : index
    %c0_4 = arith.constant 0 : index
    %2 = vector.load %arg3[%c0_3, %c0_4] : memref<1x128xf32, #tpu.memory_space<vmem>>, vector<1x128xf32>
    %cst = arith.constant dense<0.000000e+00> : vector<16x128xf32>
    %3 = tpu.matmul %0, %1, %cst {dimension_numbers = #tpu.dot_dimension_numbers<[1], [0], [0], [1], [0, 0, 1, 1], [], []>} : vector<16x128xbf16>, vector<128x128xbf16>, vector<16x128xf32> -> vector<16x128xf32>
    %4 = vector.broadcast %2 : vector<1x128xf32> to vector<16x128xf32>
    %5 = arith.addf %3, %4 : vector<16x128xf32>
    %cst_5 = arith.constant 0.000000e+00 : f32
    %6 = vector.broadcast %cst_5 : f32 to vector<16x128xf32>
    %7 = arith.maximumf %5, %6 : vector<16x128xf32>
    %8 = arith.truncf %7 : vector<16x128xf32> to vector<16x128xbf16>
    %c0_6 = arith.constant 0 : index
    %c0_7 = arith.constant 0 : index
    %9 = vector.load %arg4[%c0_6, %c0_7] : memref<128x128xbf16, #tpu.memory_space<vmem>>, vector<128x128xbf16>
    %c0_8 = arith.constant 0 : index
    %c0_9 = arith.constant 0 : index
    %10 = vector.load %arg5[%c0_8, %c0_9] : memref<1x128xf32, #tpu.memory_space<vmem>>, vector<1x128xf32>
    %cst_10 = arith.constant dense<0.000000e+00> : vector<16x128xf32>
    %11 = tpu.matmul %8, %9, %cst_10 {dimension_numbers = #tpu.dot_dimension_numbers<[1], [0], [0], [1], [0, 0, 1, 1], [], []>} : vector<16x128xbf16>, vector<128x128xbf16>, vector<16x128xf32> -> vector<16x128xf32>
    %12 = vector.broadcast %10 : vector<1x128xf32> to vector<16x128xf32>
    %13 = arith.addf %11, %12 : vector<16x128xf32>
    %cst_11 = arith.constant 0.000000e+00 : f32
    %14 = vector.broadcast %cst_11 : f32 to vector<16x128xf32>
    %15 = arith.maximumf %13, %14 : vector<16x128xf32>
    %16 = arith.truncf %15 : vector<16x128xf32> to vector<16x128xbf16>
    %c0_12 = arith.constant 0 : index
    %c0_13 = arith.constant 0 : index
    %17 = vector.load %arg6[%c0_12, %c0_13] : memref<128x128xbf16, #tpu.memory_space<vmem>>, vector<128x128xbf16>
    %c0_14 = arith.constant 0 : index
    %c0_15 = arith.constant 0 : index
    %18 = vector.load %arg7[%c0_14, %c0_15] : memref<1x128xf32, #tpu.memory_space<vmem>>, vector<1x128xf32>
    %cst_16 = arith.constant dense<0.000000e+00> : vector<16x128xf32>
    %19 = tpu.matmul %16, %17, %cst_16 {dimension_numbers = #tpu.dot_dimension_numbers<[1], [0], [0], [1], [0, 0, 1, 1], [], []>} : vector<16x128xbf16>, vector<128x128xbf16>, vector<16x128xf32> -> vector<16x128xf32>
    %20 = vector.broadcast %18 : vector<1x128xf32> to vector<16x128xf32>
    %21 = arith.addf %19, %20 : vector<16x128xf32>
    %cst_17 = arith.constant 0.000000e+00 : f32
    %22 = vector.broadcast %cst_17 : f32 to vector<16x128xf32>
    %23 = arith.maximumf %21, %22 : vector<16x128xf32>
    %24 = arith.truncf %23 : vector<16x128xf32> to vector<16x128xbf16>
    %c0_18 = arith.constant 0 : index
    %c0_19 = arith.constant 0 : index
    %25 = vector.load %arg8[%c0_18, %c0_19] : memref<128x128xbf16, #tpu.memory_space<vmem>>, vector<128x128xbf16>
    %c0_20 = arith.constant 0 : index
    %c0_21 = arith.constant 0 : index
    %26 = vector.load %arg9[%c0_20, %c0_21] : memref<1x128xf32, #tpu.memory_space<vmem>>, vector<1x128xf32>
    %cst_22 = arith.constant dense<0.000000e+00> : vector<16x128xf32>
    %27 = tpu.matmul %24, %25, %cst_22 {dimension_numbers = #tpu.dot_dimension_numbers<[1], [0], [0], [1], [0, 0, 1, 1], [], []>} : vector<16x128xbf16>, vector<128x128xbf16>, vector<16x128xf32> -> vector<16x128xf32>
    %28 = vector.broadcast %26 : vector<1x128xf32> to vector<16x128xf32>
    %29 = arith.addf %27, %28 : vector<16x128xf32>
    %cst_23 = arith.constant 0.000000e+00 : f32
    %30 = vector.broadcast %cst_23 : f32 to vector<16x128xf32>
    %31 = arith.subf %30, %29 : vector<16x128xf32>
    %32 = math.exp %31 : vector<16x128xf32>
    %cst_24 = arith.constant 1.000000e+00 : f32
    %33 = vector.broadcast %cst_24 : f32 to vector<16x128xf32>
    %34 = arith.addf %33, %32 : vector<16x128xf32>
    %35 = tpu.reciprocal %34 {approx = true} : vector<16x128xf32> -> vector<16x128xf32>
    %36 = arith.truncf %35 : vector<16x128xf32> to vector<16x128xbf16>
    %c0_25 = arith.constant 0 : index
    %c0_26 = arith.constant 0 : index
    %37 = vector.load %arg10[%c0_25, %c0_26] : memref<16x128xbf16, #tpu.memory_space<vmem>>, vector<16x128xbf16>
    tpu.vector_store %arg10[%c0_25, %c0_26], %36 {strides = array<i32>} : memref<16x128xbf16, #tpu.memory_space<vmem>>, vector<16x128xbf16>,
    return
  }
  func.func @transform_0(%arg0: i32) -> (i32, i32) {
    %c0_i32 = arith.constant 0 : i32
    %c0_i32_0 = arith.constant 0 : i32
    return %arg0, %c0_i32 : i32, i32
  }
  func.func @transform_1(%arg0: i32) -> (i32, i32) {
    %c0_i32 = arith.constant 0 : i32
    %c0_i32_0 = arith.constant 0 : i32
    %c0_i32_1 = arith.constant 0 : i32
    return %c0_i32, %c0_i32_0 : i32, i32
  }
  func.func @transform_2(%arg0: i32) -> (i32, i32) {
    %c0_i32 = arith.constant 0 : i32
    %c0_i32_0 = arith.constant 0 : i32
    %c0_i32_1 = arith.constant 0 : i32
    return %c0_i32, %c0_i32_0 : i32, i32
  }
  func.func @transform_3(%arg0: i32) -> (i32, i32) {
    %c0_i32 = arith.constant 0 : i32
    %c0_i32_0 = arith.constant 0 : i32
    %c0_i32_1 = arith.constant 0 : i32
    return %c0_i32, %c0_i32_0 : i32, i32
  }
  func.func @transform_4(%arg0: i32) -> (i32, i32) {
    %c0_i32 = arith.constant 0 : i32
    %c0_i32_0 = arith.constant 0 : i32
    %c0_i32_1 = arith.constant 0 : i32
    return %c0_i32, %c0_i32_0 : i32, i32
  }
  func.func @transform_5(%arg0: i32) -> (i32, i32) {
    %c0_i32 = arith.constant 0 : i32
    %c0_i32_0 = arith.constant 0 : i32
    %c0_i32_1 = arith.constant 0 : i32
    return %c0_i32, %c0_i32_0 : i32, i32
  }
  func.func @transform_6(%arg0: i32) -> (i32, i32) {
    %c0_i32 = arith.constant 0 : i32
    %c0_i32_0 = arith.constant 0 : i32
    %c0_i32_1 = arith.constant 0 : i32
    return %c0_i32, %c0_i32_0 : i32, i32
  }
  func.func @transform_7(%arg0: i32) -> (i32, i32) {
    %c0_i32 = arith.constant 0 : i32
    %c0_i32_0 = arith.constant 0 : i32
    %c0_i32_1 = arith.constant 0 : i32
    return %c0_i32, %c0_i32_0 : i32, i32
  }
  func.func @transform_8(%arg0: i32) -> (i32, i32) {
    %c0_i32 = arith.constant 0 : i32
    %c0_i32_0 = arith.constant 0 : i32
    %c0_i32_1 = arith.constant 0 : i32
    return %c0_i32, %c0_i32_0 : i32, i32
  }
  func.func @transform_9(%arg0: i32) -> (i32, i32) {
    %c0_i32 = arith.constant 0 : i32
    %c0_i32_0 = arith.constant 0 : i32
    return %arg0, %c0_i32 : i32, i32
  }
}

</mosaic_0001>

<bundles_post_ra>
// kernel: tpu_custom_call.1
= control target key start
LH: loop header
LB: loop body
LE: loop exit
PB: predicated region body
PF: predicated region fallthrough
CT: control target
= control target key end

     0   :  { %14 = vsyncpa [#allocation3], 0  ;;  %s1095_s0 = inlined_call_operand.hbm [shape: bf16[16,128], index: 0, kind: input, shape index: {}]   ;;  %s1096_s1 = inlined_call_operand.hbm [shape: bf16[128,128], index: 1, kind: input, shape index: {}]   ;;  %s1097_s2 = inlined_call_operand.vmem [shape: f32[1,128], index: 2, kind: input, shape index: {}]   ;;  %s1098_s3 = inlined_call_operand.hbm [shape: bf16[128,128], index: 3, kind: input, shape index: {}]   ;;  %s1099_s4 = inlined_call_operand.vmem [shape: f32[1,128], index: 4, kind: input, shape index: {}]   ;;  %s1100_s5 = inlined_call_operand.hbm [shape: bf16[128,128], index: 5, kind: input, shape index: {}]   ;;  %s1101_s6 = inlined_call_operand.vmem [shape: f32[1,128], index: 6, kind: input, shape index: {}]   ;;  %s1102_s7 = inlined_call_operand.hbm [shape: bf16[128,128], index: 7, kind: input, shape index: {}]   ;;  %s1103_s8 = inlined_call_operand.vmem [shape: f32[1,128], index: 8, kind: input, shape index: {}]   ;;  %s1104_s9 = inlined_call_operand.hbm [shape: bf16[16,128], index: 9, kind: output, shape index: {}]  }
   0x1   :  { %15 = vsyncpa [#allocation6], 0 }
   0x2   :  { %16 = vsyncpa [#allocation9], 0 }
   0x3   :  { %17 = vsyncpa [#allocation4], 0  ;;  %s947_s30 = smov [#allocation5]   ;;  %s948_s11 = smov [#allocation8]  }
   0x4   :  { %s35_s10 = sshll.u32 %s947_s30, 4  ;;  %s63_s12 = sshll.u32 %s948_s11, 4  ;;  %s36_s10 = int_to_ptr.vmem [resolvable:$true] %s35_s10  ;;  %s64_s12 = int_to_ptr.vmem [resolvable:$true] %s63_s12 }
   0x5   :  { %s827_s13 = scalar_lea.vmem %s36_s10, 1024  ;;  %p832_p1 = scmp.lt.s32.totalorder %s36_s10, %s36_s10 }
   0x6   :  { %p828_p0 = scmp.ne.s32.totalorder %s36_s10, %s827_s13  ;;  %p833_p2 = scmp.lt.s32.totalorder %s827_s13, %s827_s13 }
   0x8   :  { %p834_p3 = por %p833_p2, %p832_p1 }
   0xa   :  { %p835_p4 = pnand %p834_p3, %p828_p0 }
   0xc   :  { %838 = shalt.err (!%p835_p4)
}
   0xd   :  { %s949_s14 = smov 64   ;;  %s950_s15 = smov 4  }
   0xe   :  { %41 = dma.hbm_to_vmem [thread:$0]  %s1096_s1, 1024, %s36_s10, [#allocation6], %s949_s14, %s949_s14, %s950_s15  }
   0xf   :  { %s847_s18 = scalar_lea.vmem %s64_s12, 1024  ;;  %p852_p6 = scmp.lt.s32.totalorder %s64_s12, %s64_s12 }
  0x10   :  { %p848_p5 = scmp.ne.s32.totalorder %s64_s12, %s847_s18  ;;  %p853_p7 = scmp.lt.s32.totalorder %s847_s18, %s847_s18 }
  0x12   :  { %p854_p8 = por %p853_p7, %p852_p6 }
  0x14   :  { %p855_p9 = pnand %p854_p8, %p848_p5 }
  0x16   :  { %858 = shalt.err (!%p855_p9)
}
  0x17   :  { %69 = dma.hbm_to_vmem [thread:$0]  %s1100_s5, 1024, %s64_s12, [#allocation9], %s949_s14, %s949_s14, %s950_s15  }
  0x18   :  { %s951_s21 = smov [#allocation2]   ;;  %s952_s23 = smov [#allocation7]  }
  0x19   :  { %s23_s22 = sshll.u32 %s951_s21, 4  ;;  %s49_s24 = sshll.u32 %s952_s23, 4  ;;  %s24_s22 = int_to_ptr.vmem [resolvable:$true] %s23_s22  ;;  %s50_s24 = int_to_ptr.vmem [resolvable:$true] %s49_s24 }
  0x1a   :  { %s867_s1 = scalar_lea.vmem %s24_s22, 128  ;;  %p872_p11 = scmp.lt.s32.totalorder %s24_s22, %s24_s22 }
  0x1b   :  { %p868_p10 = scmp.ne.s32.totalorder %s24_s22, %s867_s1  ;;  %p873_p12 = scmp.lt.s32.totalorder %s867_s1, %s867_s1 }
  0x1d   :  { %p874_p13 = por %p873_p12, %p872_p11 }
  0x1f   :  { %p875_p0 = pnand %p874_p13, %p868_p10 }
  0x21   :  { %878 = shalt.err (!%p875_p0)
}
  0x22   :  { %29 = dma.hbm_to_vmem [thread:$0]  %s1095_s0, 128, %s24_s22, [#allocation3], %s949_s14, %s949_s14, %s950_s15  }
  0x23   :  { %s887_s5 = scalar_lea.vmem %s50_s24, 1024  ;;  %p892_p2 = scmp.lt.s32.totalorder %s50_s24, %s50_s24 }
  0x24   :  { %p888_p1 = scmp.ne.s32.totalorder %s50_s24, %s887_s5  ;;  %p893_p3 = scmp.lt.s32.totalorder %s887_s5, %s887_s5 }
  0x26   :  { %p894_p4 = por %p893_p3, %p892_p2 }
  0x28   :  { %p895_p5 = pnand %p894_p4, %p888_p1 }
  0x2a   :  { %898 = shalt.err (!%p895_p5)
}
  0x2b   :  { %55 = dma.hbm_to_vmem [thread:$0]  %s1098_s3, 1024, %s50_s24, [#allocation6], %s949_s14, %s949_s14, %s950_s15  }
  0x2c   :  { %s953_s29 = smov [#allocation10]  }
  0x2d   :  { %s77_s30 = sshll.u32 %s953_s29, 4  ;;  %s78_s30 = int_to_ptr.vmem [resolvable:$true] %s77_s30 }
  0x2e   :  { %s907_s10 = scalar_lea.vmem %s78_s30, 1024  ;;  %p912_p7 = scmp.lt.s32.totalorder %s78_s30, %s78_s30 }
  0x2f   :  { %p908_p6 = scmp.ne.s32.totalorder %s78_s30, %s907_s10  ;;  %p913_p8 = scmp.lt.s32.totalorder %s907_s10, %s907_s10 }
  0x31   :  { %p914_p9 = por %p913_p8, %p912_p7 }
  0x33   :  { %p915_p10 = pnand %p914_p9, %p908_p6 }
  0x35   :  { %918 = shalt.err (!%p915_p10)
}
  0x36   :  { %83 = dma.hbm_to_vmem [thread:$0]  %s1102_s7, 1024, %s78_s30, [#allocation9], %s949_s14, %s949_s14, %s950_s15  }
  0x37   :  { %939 = dma.done.wait [#allocation3], 128  }
  0x38   :  { %940 = vsyncadd [#allocation3], 4294967168 }
  0x39   :  { %941 = dma.done.wait [#allocation6], 2048  }
  0x3a   :  { %942 = vsyncadd [#allocation6], 4294965248 }
  0x3b   :  { %943 = dma.done.wait [#allocation9], 2048  }
  0x3c   :  { %944 = vsyncadd [#allocation9], 4294965248  ;;  %v954_v0 = vmov 0.0   ;;  %vm955_vm0 = vmmov 0   ;;  %v778_v1 = vld [vmem:[#allocation5 + $0x38] sm:$0xff]   ;;  %v779_v2 = vld [vmem:[#allocation5 + $0x30] sm:$0xff]  }
  0x3d   :  { %688 = vmatprep.subr.bf16.mxu0 %v954_v0  ;;  %704 = vmatprep.mubr.msk.bf16.mxu0 %vm955_vm0, %v954_v0  ;;  %v780_v3 = vld [vmem:[#allocation5 + $0x28] sm:$0xff]   ;;  %v787_v4 = vld [vmem:[#allocation7 + $0x38] sm:$0xff]   ;;  %v781_v5 = vld [vmem:[#allocation5 + $0x20] sm:$0xff]  }
  0x3e   :  { %708 = vmatprep.subr.bf16.mxu1 %v954_v0  ;;  %724 = vmatprep.mubr.msk.bf16.mxu1 %vm955_vm0, %v954_v0  ;;  %v788_v6 = vld [vmem:[#allocation7 + $0x30] sm:$0xff]   ;;  %v782_v7 = vld [vmem:[#allocation5 + $0x18] sm:$0xff]   ;;  %v789_v8 = vld [vmem:[#allocation7 + $0x28] sm:$0xff]  }
  0x3f   :  { %689 = vmatpush3.bf16.msra.mxu0 %v778_v1  ;;  %709 = vmatpush3.bf16.msra.mxu1 %v787_v4  ;;  %v783_v9 = vld [vmem:[#allocation5 + $0x10] sm:$0xff]   ;;  %v790_v10 = vld [vmem:[#allocation7 + $0x20] sm:$0xff]   ;;  %v784_v11 = vld [vmem:[#allocation5 + $0x8] sm:$0xff]  }
  0x40   :  { %690 = vmatprep.subr.bf16.mxu0 %v954_v0  ;;  %710 = vmatprep.subr.bf16.mxu1 %v954_v0  ;;  %v791_v12 = vld [vmem:[#allocation7 + $0x18] sm:$0xff]   ;;  %v785_v13 = vld [vmem:[#allocation5] sm:$0xff]   ;;  %v792_v15 = vld [vmem:[#allocation7 + $0x10] sm:$0xff]  }
  0x41   :  { %v786_v14 = vld [vmem:[#allocation2] sm:$0xff]   ;;  %v793_v16 = vld [vmem:[#allocation7 + $0x8] sm:$0xff]   ;;  %v794_v17 = vld [vmem:[#allocation7] sm:$0xff]  }
  0x42   :  { %v795_v18 = vld [vmem:[#allocation8 + $0x38] sm:$0xff]   ;;  %v796_v19 = vld [vmem:[#allocation8 + $0x30] sm:$0xff]   ;;  %v797_v20 = vld [vmem:[#allocation8 + $0x28] sm:$0xff]  }
  0x43   :  { %691 = vmatpush3.bf16.msra.mxu0 %v779_v2  ;;  %711 = vmatpush3.bf16.msra.mxu1 %v788_v6  ;;  %v798_v21 = vld [vmem:[#allocation8 + $0x20] sm:$0xff]   ;;  %v799_v22 = vld [vmem:[#allocation8 + $0x18] sm:$0xff]   ;;  %v800_v33 = vld [vmem:[#allocation8 + $0x10] sm:$0xff]  }
  0x44   :  { %692 = vmatprep.subr.bf16.mxu0 %v954_v0  ;;  %712 = vmatprep.subr.bf16.mxu1 %v954_v0  ;;  %v606_v23 = vld [vmem:[%s1097_s2] ss:$0 sm:$0xff]  ;;  %v801_v34 = vld [vmem:[#allocation8 + $0x8] sm:$0xff]   ;;  %v802_v35 = vld [vmem:[#allocation8] sm:$0xff]  }
  0x45   :  { %v803_v36 = vld [vmem:[#allocation10 + $0x38] sm:$0xff]   ;;  %v804_v37 = vld [vmem:[#allocation10 + $0x30] sm:$0xff]   ;;  %v805_v38 = vld [vmem:[#allocation10 + $0x28] sm:$0xff]  }
  0x46   :  { %v806_v39 = vld [vmem:[#allocation10 + $0x20] sm:$0xff]   ;;  %v807_v40 = vld [vmem:[#allocation10 + $0x18] sm:$0xff]   ;;  %v808_v51 = vld [vmem:[#allocation10 + $0x10] sm:$0xff]  }
  0x47   :  { %693 = vmatpush3.bf16.msra.mxu0 %v780_v3  ;;  %713 = vmatpush3.bf16.msra.mxu1 %v789_v8  ;;  %v616_v41 = vld [vmem:[%s1099_s4] ss:$0 sm:$0xff]  ;;  %v809_v52 = vld [vmem:[#allocation10 + $0x8] sm:$0xff]   ;;  %v810_v53 = vld [vmem:[#allocation10] sm:$0xff]  }
  0x48   :  { %694 = vmatprep.subr.bf16.mxu0 %v954_v0  ;;  %714 = vmatprep.subr.bf16.mxu1 %v954_v0  ;;  %v625_v54 = vld [vmem:[%s1101_s6] ss:$0 sm:$0xff]  ;;  %s956_s6 = smov [#allocation11]  }
  0x4b   :  { %695 = vmatpush3.bf16.msra.mxu0 %v781_v5  ;;  %715 = vmatpush3.bf16.msra.mxu1 %v790_v10 }
  0x4c   :  { %696 = vmatprep.subr.bf16.mxu0 %v954_v0  ;;  %716 = vmatprep.subr.bf16.mxu1 %v954_v0 }
  0x4f   :  { %697 = vmatpush3.bf16.msra.mxu0 %v782_v7  ;;  %717 = vmatpush3.bf16.msra.mxu1 %v791_v12 }
  0x50   :  { %698 = vmatprep.subr.bf16.mxu0 %v954_v0  ;;  %718 = vmatprep.subr.bf16.mxu1 %v954_v0 }
  0x53   :  { %699 = vmatpush3.bf16.msra.mxu0 %v783_v9  ;;  %719 = vmatpush3.bf16.msra.mxu1 %v792_v15 }
  0x54   :  { %700 = vmatprep.subr.bf16.mxu0 %v954_v0  ;;  %720 = vmatprep.subr.bf16.mxu1 %v954_v0 }
  0x57   :  { %701 = vmatpush3.bf16.msra.mxu0 %v784_v11  ;;  %721 = vmatpush3.bf16.msra.mxu1 %v793_v16 }
  0x58   :  { %702 = vmatprep.subr.bf16.mxu0 %v954_v0  ;;  %722 = vmatprep.subr.bf16.mxu1 %v954_v0 }
  0x5b   :  { %703 = vmatpush3.bf16.msra.mxu0 %v785_v13  ;;  %723 = vmatpush3.bf16.msra.mxu1 %v794_v17 }
  0x5c   :  { %728 = vmatprep.subr.bf16.mxu0 %v954_v0  ;;  %748 = vmatprep.subr.bf16.mxu1 %v954_v0 }
  0x5e   :  { %705 = vmatmul.mubr.bf16.vlgmr.msra.gmra.mxu0 %v786_v14 }
  0x5f   :  { %744 = vmatprep.mubr.msk.bf16.mxu0 %vm955_vm0, %v954_v0  ;;  %729 = vmatpush3.bf16.msra.mxu0 %v795_v18 }
  0x60   :  { %730 = vmatprep.subr.bf16.mxu0 %v954_v0 }
  0x63   :  { %731 = vmatpush3.bf16.msra.mxu0 %v796_v19 }
  0x64   :  { %732 = vmatprep.subr.bf16.mxu0 %v954_v0 }
  0x67   :  { %733 = vmatpush3.bf16.msra.mxu0 %v797_v20 }
  0x68   :  { %734 = vmatprep.subr.bf16.mxu0 %v954_v0 }
  0x6b   :  { %735 = vmatpush3.bf16.msra.mxu0 %v798_v21 }
  0x6c   :  { %736 = vmatprep.subr.bf16.mxu0 %v954_v0 }
  0x6f   :  { %737 = vmatpush3.bf16.msra.mxu0 %v799_v22 }
  0x70   :  { %738 = vmatprep.subr.bf16.mxu0 %v954_v0 }
  0x73   :  { %739 = vmatpush3.bf16.msra.mxu0 %v800_v33 }
  0x74   :  { %740 = vmatprep.subr.bf16.mxu0 %v954_v0 }
  0x77   :  { %741 = vmatpush3.bf16.msra.mxu0 %v801_v34 }
  0x78   :  { %742 = vmatprep.subr.bf16.mxu0 %v954_v0 }
  0x7b   :  { %743 = vmatpush3.bf16.msra.mxu0 %v802_v35 }
 0x11e   :  { %v215_v24 = vpop.f32.mrf.mxu0 }
 0x11f   :  { %v216_v26 = vadd.f32 %v606_v23, %v215_v24 }
 0x120   :  { %v706_v25 = vpop.f32.mrf.mxu0 }
 0x121   :  { %v222_v30 = vmax.f32 %v216_v26, 0.0 }
 0x122   :  { %v218_v27 = vpop.f32.mrf.mxu0 }
 0x123   :  { %v219_v28 = vadd.f32 %v606_v23, %v218_v27 }
 0x124   :  { %v707_v29 = vpop.f32.mrf.mxu0 }
 0x125   :  { %v223_v31 = vmax.f32 %v219_v28, 0.0 }
 0x127   :  { %v224_v32 = vpack.c.bf16 %v223_v31, %v222_v30 }
 0x129   :  { %725 = vmatmul.mubr.bf16.vlgmr.msra.gmra.mxu1 %v224_v32 }
 0x12a   :  { %764 = vmatprep.mubr.msk.bf16.mxu1 %vm955_vm0, %v954_v0  ;;  %749 = vmatpush3.bf16.msra.mxu1 %v803_v36 }
 0x12b   :  { %750 = vmatprep.subr.bf16.mxu1 %v954_v0 }
 0x12e   :  { %751 = vmatpush3.bf16.msra.mxu1 %v804_v37 }
 0x12f   :  { %752 = vmatprep.subr.bf16.mxu1 %v954_v0 }
 0x132   :  { %753 = vmatpush3.bf16.msra.mxu1 %v805_v38 }
 0x133   :  { %754 = vmatprep.subr.bf16.mxu1 %v954_v0 }
 0x136   :  { %755 = vmatpush3.bf16.msra.mxu1 %v806_v39 }
 0x137   :  { %756 = vmatprep.subr.bf16.mxu1 %v954_v0 }
 0x13a   :  { %757 = vmatpush3.bf16.msra.mxu1 %v807_v40 }
 0x13b   :  { %758 = vmatprep.subr.bf16.mxu1 %v954_v0 }
 0x13e   :  { %759 = vmatpush3.bf16.msra.mxu1 %v808_v51 }
 0x13f   :  { %760 = vmatprep.subr.bf16.mxu1 %v954_v0 }
 0x142   :  { %761 = vmatpush3.bf16.msra.mxu1 %v809_v52 }
 0x143   :  { %762 = vmatprep.subr.bf16.mxu1 %v954_v0  ;;  %v634_v0 = vld [vmem:[%s1103_s8] ss:$0 sm:$0xff]  ;;  %s592_s8 = sshll.u32 %s956_s6, 4  ;;  %s593_s8 = int_to_ptr.vmem [resolvable:$true] %s592_s8 }
 0x144   :  { %s919_s18 = scalar_lea.vmem %s593_s8, 128  ;;  %p924_p12 = scmp.lt.s32.totalorder %s593_s8, %s593_s8 }
 0x145   :  { %p920_p11 = scmp.ne.s32.totalorder %s593_s8, %s919_s18  ;;  %p925_p13 = scmp.lt.s32.totalorder %s919_s18, %s919_s18 }
 0x146   :  { %763 = vmatpush3.bf16.msra.mxu1 %v810_v53 }
 0x147   :  { %p926_p0 = por %p925_p13, %p924_p12 }
 0x149   :  { %p927_p1 = pnand %p926_p0, %p920_p11 }
 0x1e9   :  { %v330_v42 = vpop.f32.mrf.mxu1 }
 0x1ea   :  { %v331_v44 = vadd.f32 %v616_v41, %v330_v42 }
 0x1eb   :  { %v726_v43 = vpop.f32.mrf.mxu1 }
 0x1ec   :  { %v337_v48 = vmax.f32 %v331_v44, 0.0 }
 0x1ed   :  { %v333_v45 = vpop.f32.mrf.mxu1 }
 0x1ee   :  { %v334_v46 = vadd.f32 %v616_v41, %v333_v45 }
 0x1ef   :  { %v727_v47 = vpop.f32.mrf.mxu1 }
 0x1f0   :  { %v338_v49 = vmax.f32 %v334_v46, 0.0 }
 0x1f2   :  { %v339_v50 = vpack.c.bf16 %v338_v49, %v337_v48 }
 0x1f4   :  { %745 = vmatmul.mubr.bf16.vlgmr.msra.gmra.mxu0 %v339_v50 }
 0x2b4   :  { %v445_v55 = vpop.f32.mrf.mxu0 }
 0x2b5   :  { %v446_v57 = vadd.f32 %v625_v54, %v445_v55 }
 0x2b6   :  { %v746_v56 = vpop.f32.mrf.mxu0 }
 0x2b7   :  { %v452_v61 = vmax.f32 %v446_v57, 0.0 }
 0x2b8   :  { %v448_v58 = vpop.f32.mrf.mxu0 }
 0x2b9   :  { %v449_v59 = vadd.f32 %v625_v54, %v448_v58 }
 0x2ba   :  { %v747_v60 = vpop.f32.mrf.mxu0 }
 0x2bb   :  { %v453_v62 = vmax.f32 %v449_v59, 0.0 }
 0x2bd   :  { %v454_v63 = vpack.c.bf16 %v453_v62, %v452_v61 }
 0x2bf   :  { %765 = vmatmul.mubr.bf16.vlgmr.msra.gmra.mxu1 %v454_v63 }
 0x37f   :  { %v560_v1 = vpop.f32.mrf.mxu1 }
 0x380   :  { %v561_v2 = vadd.f32 %v634_v0, %v560_v1 }
 0x381   :  { %v766_v3 = vpop.f32.mrf.mxu1 }
 0x382   :  { %v567_v4 = vsub.f32 0.0, %v561_v2 }
 0x383   :  { %v563_v5 = vpop.f32.mrf.mxu1 }
 0x384   :  { %v569_v6 = vmul.f32 1.442695, %v567_v4  ;;  %v564_v7 = vadd.f32 %v634_v0, %v563_v5 }
 0x385   :  { %v767_v8 = vpop.f32.mrf.mxu1 }
 0x386   :  { %811 = vpow2.f32 %v569_v6  ;;  %v568_v9 = vsub.f32 0.0, %v564_v7 }
 0x388   :  { %v571_v10 = vmul.f32 1.442695, %v568_v9 }
 0x38a   :  { %813 = vpow2.f32 %v571_v10 }
 0x393   :  { %v812_v11 = vpop.eup %811 }
 0x394   :  { %v573_v12 = vadd.f32 1.0, %v812_v11 }
 0x396   :  { %815 = vrcp.f32 %v573_v12 }
 0x397   :  { %v814_v13 = vpop.eup %813 }
 0x398   :  { %v574_v14 = vadd.f32 1.0, %v814_v13 }
 0x39a   :  { %817 = vrcp.f32 %v574_v14 }
 0x3a3   :  { %v816_v15 = vpop.eup %815 }
 0x3a7   :  { %v818_v16 = vpop.eup %817 }
 0x3a8   :  { %v650_v17 = vpack.c.bf16 %v818_v16, %v816_v15 }
 0x3aa   :  { %651 = vst [vmem:[#allocation11] sm:$0xff] %v650_v17  }
 0x3ab   :  { %930 = shalt.err (!%p927_p1)
}
 0x3ac   :  { %598 = dma.vmem_to_hbm [thread:$0]  %s593_s8, 128, %s1104_s9, [#allocation4], %s949_s14, %s949_s14, %s950_s15  }
 0x3ad   :  { %945 = dma.done.wait [#allocation4], 128  }
 0x3ae   :  { %946 = vsyncadd [#allocation4], 4294967168 }
 0x3af   :  { %602 = vsyncpa [#allocation3], 1 }
 0x3b0   :  { %603 = vsyncpa [#allocation6], 1 }
 0x3b1   :  { %604 = vsyncpa [#allocation9], 1 }
 0x3b2   :  { %605 = vsyncpa [#allocation4], 1 }

// kernel: tpu_custom_call.1
= control target key start
LH: loop header
LB: loop body
LE: loop exit
PB: predicated region body
PF: predicated region fallthrough
CT: control target
= control target key end

     0   :  { %14 = vsyncpa [#allocation3], 0  ;;  %s1095_s0 = inlined_call_operand.hbm [shape: bf16[16,128], index: 0, kind: input, shape index: {}]   ;;  %s1096_s1 = inlined_call_operand.hbm [shape: bf16[128,128], index: 1, kind: input, shape index: {}]   ;;  %s1097_s2 = inlined_call_operand.vmem [shape: f32[1,128], index: 2, kind: input, shape index: {}]   ;;  %s1098_s3 = inlined_call_operand.hbm [shape: bf16[128,128], index: 3, kind: input, shape index: {}]   ;;  %s1099_s4 = inlined_call_operand.vmem [shape: f32[1,128], index: 4, kind: input, shape index: {}]   ;;  %s1100_s5 = inlined_call_operand.hbm [shape: bf16[128,128], index: 5, kind: input, shape index: {}]   ;;  %s1101_s6 = inlined_call_operand.vmem [shape: f32[1,128], index: 6, kind: input, shape index: {}]   ;;  %s1102_s7 = inlined_call_operand.hbm [shape: bf16[128,128], index: 7, kind: input, shape index: {}]   ;;  %s1103_s8 = inlined_call_operand.vmem [shape: f32[1,128], index: 8, kind: input, shape index: {}]   ;;  %s1104_s9 = inlined_call_operand.hbm [shape: bf16[16,128], index: 9, kind: output, shape index: {}]  }
   0x1   :  { %15 = vsyncpa [#allocation6], 0 }
   0x2   :  { %16 = vsyncpa [#allocation9], 0 }
   0x3   :  { %17 = vsyncpa [#allocation4], 0  ;;  %s947_s30 = smov [#allocation5]   ;;  %s948_s11 = smov [#allocation8]  }
   0x4   :  { %s35_s10 = sshll.u32 %s947_s30, 4  ;;  %s63_s12 = sshll.u32 %s948_s11, 4  ;;  %s36_s10 = int_to_ptr.vmem [resolvable:$true] %s35_s10  ;;  %s64_s12 = int_to_ptr.vmem [resolvable:$true] %s63_s12 }
   0x5   :  { %s827_s13 = scalar_lea.vmem %s36_s10, 1024  ;;  %p832_p1 = scmp.lt.s32.totalorder %s36_s10, %s36_s10 }
   0x6   :  { %p828_p0 = scmp.ne.s32.totalorder %s36_s10, %s827_s13  ;;  %p833_p2 = scmp.lt.s32.totalorder %s827_s13, %s827_s13 }
   0x8   :  { %p834_p3 = por %p833_p2, %p832_p1 }
   0xa   :  { %p835_p4 = pnand %p834_p3, %p828_p0 }
   0xc   :  { %838 = shalt.err (!%p835_p4)
}
   0xd   :  { %s949_s14 = smov 64   ;;  %s950_s15 = smov 4  }
   0xe   :  { %41 = dma.hbm_to_vmem [thread:$0]  %s1096_s1, 1024, %s36_s10, [#allocation6], %s949_s14, %s949_s14, %s950_s15  }
   0xf   :  { %s847_s18 = scalar_lea.vmem %s64_s12, 1024  ;;  %p852_p6 = scmp.lt.s32.totalorder %s64_s12, %s64_s12 }
  0x10   :  { %p848_p5 = scmp.ne.s32.totalorder %s64_s12, %s847_s18  ;;  %p853_p7 = scmp.lt.s32.totalorder %s847_s18, %s847_s18 }
  0x12   :  { %p854_p8 = por %p853_p7, %p852_p6 }
  0x14   :  { %p855_p9 = pnand %p854_p8, %p848_p5 }
  0x16   :  { %858 = shalt.err (!%p855_p9)
}
  0x17   :  { %69 = dma.hbm_to_vmem [thread:$0]  %s1100_s5, 1024, %s64_s12, [#allocation9], %s949_s14, %s949_s14, %s950_s15  }
  0x18   :  { %s951_s21 = smov [#allocation2]   ;;  %s952_s23 = smov [#allocation7]  }
  0x19   :  { %s23_s22 = sshll.u32 %s951_s21, 4  ;;  %s49_s24 = sshll.u32 %s952_s23, 4  ;;  %s24_s22 = int_to_ptr.vmem [resolvable:$true] %s23_s22  ;;  %s50_s24 = int_to_ptr.vmem [resolvable:$true] %s49_s24 }
  0x1a   :  { %s867_s1 = scalar_lea.vmem %s24_s22, 128  ;;  %p872_p11 = scmp.lt.s32.totalorder %s24_s22, %s24_s22 }
  0x1b   :  { %p868_p10 = scmp.ne.s32.totalorder %s24_s22, %s867_s1  ;;  %p873_p12 = scmp.lt.s32.totalorder %s867_s1, %s867_s1 }
  0x1d   :  { %p874_p13 = por %p873_p12, %p872_p11 }
  0x1f   :  { %p875_p0 = pnand %p874_p13, %p868_p10 }
  0x21   :  { %878 = shalt.err (!%p875_p0)
}
  0x22   :  { %29 = dma.hbm_to_vmem [thread:$0]  %s1095_s0, 128, %s24_s22, [#allocation3], %s949_s14, %s949_s14, %s950_s15  }
  0x23   :  { %s887_s5 = scalar_lea.vmem %s50_s24, 1024  ;;  %p892_p2 = scmp.lt.s32.totalorder %s50_s24, %s50_s24 }
  0x24   :  { %p888_p1 = scmp.ne.s32.totalorder %s50_s24, %s887_s5  ;;  %p893_p3 = scmp.lt.s32.totalorder %s887_s5, %s887_s5 }
  0x26   :  { %p894_p4 = por %p893_p3, %p892_p2 }
  0x28   :  { %p895_p5 = pnand %p894_p4, %p888_p1 }
  0x2a   :  { %898 = shalt.err (!%p895_p5)
}
  0x2b   :  { %55 = dma.hbm_to_vmem [thread:$0]  %s1098_s3, 1024, %s50_s24, [#allocation6], %s949_s14, %s949_s14, %s950_s15  }
  0x2c   :  { %s953_s29 = smov [#allocation10]  }
  0x2d   :  { %s77_s30 = sshll.u32 %s953_s29, 4  ;;  %s78_s30 = int_to_ptr.vmem [resolvable:$true] %s77_s30 }
  0x2e   :  { %s907_s10 = scalar_lea.vmem %s78_s30, 1024  ;;  %p912_p7 = scmp.lt.s32.totalorder %s78_s30, %s78_s30 }
  0x2f   :  { %p908_p6 = scmp.ne.s32.totalorder %s78_s30, %s907_s10  ;;  %p913_p8 = scmp.lt.s32.totalorder %s907_s10, %s907_s10 }
  0x31   :  { %p914_p9 = por %p913_p8, %p912_p7 }
  0x33   :  { %p915_p10 = pnand %p914_p9, %p908_p6 }
  0x35   :  { %918 = shalt.err (!%p915_p10)
}
  0x36   :  { %83 = dma.hbm_to_vmem [thread:$0]  %s1102_s7, 1024, %s78_s30, [#allocation9], %s949_s14, %s949_s14, %s950_s15  }
  0x37   :  { %939 = dma.done.wait [#allocation3], 128  }
  0x38   :  { %940 = vsyncadd [#allocation3], 4294967168 }
  0x39   :  { %941 = dma.done.wait [#allocation6], 2048  }
  0x3a   :  { %942 = vsyncadd [#allocation6], 4294965248 }
  0x3b   :  { %943 = dma.done.wait [#allocation9], 2048  }
  0x3c   :  { %944 = vsyncadd [#allocation9], 4294965248  ;;  %v954_v0 = vmov 0.0   ;;  %vm955_vm0 = vmmov 0   ;;  %v778_v1 = vld [vmem:[#allocation5 + $0x38] sm:$0xff]   ;;  %v779_v2 = vld [vmem:[#allocation5 + $0x30] sm:$0xff]  }
  0x3d   :  { %688 = vmatprep.subr.bf16.mxu0 %v954_v0  ;;  %704 = vmatprep.mubr.msk.bf16.mxu0 %vm955_vm0, %v954_v0  ;;  %v780_v3 = vld [vmem:[#allocation5 + $0x28] sm:$0xff]   ;;  %v787_v4 = vld [vmem:[#allocation7 + $0x38] sm:$0xff]   ;;  %v781_v5 = vld [vmem:[#allocation5 + $0x20] sm:$0xff]  }
  0x3e   :  { %708 = vmatprep.subr.bf16.mxu1 %v954_v0  ;;  %724 = vmatprep.mubr.msk.bf16.mxu1 %vm955_vm0, %v954_v0  ;;  %v788_v6 = vld [vmem:[#allocation7 + $0x30] sm:$0xff]   ;;  %v782_v7 = vld [vmem:[#allocation5 + $0x18] sm:$0xff]   ;;  %v789_v8 = vld [vmem:[#allocation7 + $0x28] sm:$0xff]  }
  0x3f   :  { %689 = vmatpush3.bf16.msra.mxu0 %v778_v1  ;;  %709 = vmatpush3.bf16.msra.mxu1 %v787_v4  ;;  %v783_v9 = vld [vmem:[#allocation5 + $0x10] sm:$0xff]   ;;  %v790_v10 = vld [vmem:[#allocation7 + $0x20] sm:$0xff]   ;;  %v784_v11 = vld [vmem:[#allocation5 + $0x8] sm:$0xff]  }
  0x40   :  { %690 = vmatprep.subr.bf16.mxu0 %v954_v0  ;;  %710 = vmatprep.subr.bf16.mxu1 %v954_v0  ;;  %v791_v12 = vld [vmem:[#allocation7 + $0x18] sm:$0xff]   ;;  %v785_v13 = vld [vmem:[#allocation5] sm:$0xff]   ;;  %v792_v15 = vld [vmem:[#allocation7 + $0x10] sm:$0xff]  }
  0x41   :  { %v786_v14 = vld [vmem:[#allocation2] sm:$0xff]   ;;  %v793_v16 = vld [vmem:[#allocation7 + $0x8] sm:$0xff]   ;;  %v794_v17 = vld [vmem:[#allocation7] sm:$0xff]  }
  0x42   :  { %v795_v18 = vld [vmem:[#allocation8 + $0x38] sm:$0xff]   ;;  %v796_v19 = vld [vmem:[#allocation8 + $0x30] sm:$0xff]   ;;  %v797_v20 = vld [vmem:[#allocation8 + $0x28] sm:$0xff]  }
  0x43   :  { %691 = vmatpush3.bf16.msra.mxu0 %v779_v2  ;;  %711 = vmatpush3.bf16.msra.mxu1 %v788_v6  ;;  %v798_v21 = vld [vmem:[#allocation8 + $0x20] sm:$0xff]   ;;  %v799_v22 = vld [vmem:[#allocation8 + $0x18] sm:$0xff]   ;;  %v800_v33 = vld [vmem:[#allocation8 + $0x10] sm:$0xff]  }
  0x44   :  { %692 = vmatprep.subr.bf16.mxu0 %v954_v0  ;;  %712 = vmatprep.subr.bf16.mxu1 %v954_v0  ;;  %v606_v23 = vld [vmem:[%s1097_s2] ss:$0 sm:$0xff]  ;;  %v801_v34 = vld [vmem:[#allocation8 + $0x8] sm:$0xff]   ;;  %v802_v35 = vld [vmem:[#allocation8] sm:$0xff]  }
  0x45   :  { %v803_v36 = vld [vmem:[#allocation10 + $0x38] sm:$0xff]   ;;  %v804_v37 = vld [vmem:[#allocation10 + $0x30] sm:$0xff]   ;;  %v805_v38 = vld [vmem:[#allocation10 + $0x28] sm:$0xff]  }
  0x46   :  { %v806_v39 = vld [vmem:[#allocation10 + $0x20] sm:$0xff]   ;;  %v807_v40 = vld [vmem:[#allocation10 + $0x18] sm:$0xff]   ;;  %v808_v51 = vld [vmem:[#allocation10 + $0x10] sm:$0xff]  }
  0x47   :  { %693 = vmatpush3.bf16.msra.mxu0 %v780_v3  ;;  %713 = vmatpush3.bf16.msra.mxu1 %v789_v8  ;;  %v616_v41 = vld [vmem:[%s1099_s4] ss:$0 sm:$0xff]  ;;  %v809_v52 = vld [vmem:[#allocation10 + $0x8] sm:$0xff]   ;;  %v810_v53 = vld [vmem:[#allocation10] sm:$0xff]  }
  0x48   :  { %694 = vmatprep.subr.bf16.mxu0 %v954_v0  ;;  %714 = vmatprep.subr.bf16.mxu1 %v954_v0  ;;  %v625_v54 = vld [vmem:[%s1101_s6] ss:$0 sm:$0xff]  ;;  %s956_s6 = smov [#allocation11]  }
  0x4b   :  { %695 = vmatpush3.bf16.msra.mxu0 %v781_v5  ;;  %715 = vmatpush3.bf16.msra.mxu1 %v790_v10 }
  0x4c   :  { %696 = vmatprep.subr.bf16.mxu0 %v954_v0  ;;  %716 = vmatprep.subr.bf16.mxu1 %v954_v0 }
  0x4f   :  { %697 = vmatpush3.bf16.msra.mxu0 %v782_v7  ;;  %717 = vmatpush3.bf16.msra.mxu1 %v791_v12 }
  0x50   :  { %698 = vmatprep.subr.bf16.mxu0 %v954_v0  ;;  %718 = vmatprep.subr.bf16.mxu1 %v954_v0 }
  0x53   :  { %699 = vmatpush3.bf16.msra.mxu0 %v783_v9  ;;  %719 = vmatpush3.bf16.msra.mxu1 %v792_v15 }
  0x54   :  { %700 = vmatprep.subr.bf16.mxu0 %v954_v0  ;;  %720 = vmatprep.subr.bf16.mxu1 %v954_v0 }
  0x57   :  { %701 = vmatpush3.bf16.msra.mxu0 %v784_v11  ;;  %721 = vmatpush3.bf16.msra.mxu1 %v793_v16 }
  0x58   :  { %702 = vmatprep.subr.bf16.mxu0 %v954_v0  ;;  %722 = vmatprep.subr.bf16.mxu1 %v954_v0 }
  0x5b   :  { %703 = vmatpush3.bf16.msra.mxu0 %v785_v13  ;;  %723 = vmatpush3.bf16.msra.mxu1 %v794_v17 }
  0x5c   :  { %728 = vmatprep.subr.bf16.mxu0 %v954_v0  ;;  %748 = vmatprep.subr.bf16.mxu1 %v954_v0 }
  0x5e   :  { %705 = vmatmul.mubr.bf16.vlgmr.msra.gmra.mxu0 %v786_v14 }
  0x5f   :  { %744 = vmatprep.mubr.msk.bf16.mxu0 %vm955_vm0, %v954_v0  ;;  %729 = vmatpush3.bf16.msra.mxu0 %v795_v18 }
  0x60   :  { %730 = vmatprep.subr.bf16.mxu0 %v954_v0 }
  0x63   :  { %731 = vmatpush3.bf16.msra.mxu0 %v796_v19 }
  0x64   :  { %732 = vmatprep.subr.bf16.mxu0 %v954_v0 }
  0x67   :  { %733 = vmatpush3.bf16.msra.mxu0 %v797_v20 }
  0x68   :  { %734 = vmatprep.subr.bf16.mxu0 %v954_v0 }
  0x6b   :  { %735 = vmatpush3.bf16.msra.mxu0 %v798_v21 }
  0x6c   :  { %736 = vmatprep.subr.bf16.mxu0 %v954_v0 }
  0x6f   :  { %737 = vmatpush3.bf16.msra.mxu0 %v799_v22 }
  0x70   :  { %738 = vmatprep.subr.bf16.mxu0 %v954_v0 }
  0x73   :  { %739 = vmatpush3.bf16.msra.mxu0 %v800_v33 }
  0x74   :  { %740 = vmatprep.subr.bf16.mxu0 %v954_v0 }
  0x77   :  { %741 = vmatpush3.bf16.msra.mxu0 %v801_v34 }
  0x78   :  { %742 = vmatprep.subr.bf16.mxu0 %v954_v0 }
  0x7b   :  { %743 = vmatpush3.bf16.msra.mxu0 %v802_v35 }
 0x11e   :  { %v215_v24 = vpop.f32.mrf.mxu0 }
 0x11f   :  { %v216_v26 = vadd.f32 %v606_v23, %v215_v24 }
 0x120   :  { %v706_v25 = vpop.f32.mrf.mxu0 }
 0x121   :  { %v222_v30 = vmax.f32 %v216_v26, 0.0 }
 0x122   :  { %v218_v27 = vpop.f32.mrf.mxu0 }
 0x123   :  { %v219_v28 = vadd.f32 %v606_v23, %v218_v27 }
 0x124   :  { %v707_v29 = vpop.f32.mrf.mxu0 }
 0x125   :  { %v223_v31 = vmax.f32 %v219_v28, 0.0 }
 0x127   :  { %v224_v32 = vpack.c.bf16 %v223_v31, %v222_v30 }
 0x129   :  { %725 = vmatmul.mubr.bf16.vlgmr.msra.gmra.mxu1 %v224_v32 }
 0x12a   :  { %764 = vmatprep.mubr.msk.bf16.mxu1 %vm955_vm0, %v954_v0  ;;  %749 = vmatpush3.bf16.msra.mxu1 %v803_v36 }
 0x12b   :  { %750 = vmatprep.subr.bf16.mxu1 %v954_v0 }
 0x12e   :  { %751 = vmatpush3.bf16.msra.mxu1 %v804_v37 }
 0x12f   :  { %752 = vmatprep.subr.bf16.mxu1 %v954_v0 }
 0x132   :  { %753 = vmatpush3.bf16.msra.mxu1 %v805_v38 }
 0x133   :  { %754 = vmatprep.subr.bf16.mxu1 %v954_v0 }
 0x136   :  { %755 = vmatpush3.bf16.msra.mxu1 %v806_v39 }
 0x137   :  { %756 = vmatprep.subr.bf16.mxu1 %v954_v0 }
 0x13a   :  { %757 = vmatpush3.bf16.msra.mxu1 %v807_v40 }
 0x13b   :  { %758 = vmatprep.subr.bf16.mxu1 %v954_v0 }
 0x13e   :  { %759 = vmatpush3.bf16.msra.mxu1 %v808_v51 }
 0x13f   :  { %760 = vmatprep.subr.bf16.mxu1 %v954_v0 }
 0x142   :  { %761 = vmatpush3.bf16.msra.mxu1 %v809_v52 }
 0x143   :  { %762 = vmatprep.subr.bf16.mxu1 %v954_v0  ;;  %v634_v0 = vld [vmem:[%s1103_s8] ss:$0 sm:$0xff]  ;;  %s592_s8 = sshll.u32 %s956_s6, 4  ;;  %s593_s8 = int_to_ptr.vmem [resolvable:$true] %s592_s8 }
 0x144   :  { %s919_s18 = scalar_lea.vmem %s593_s8, 128  ;;  %p924_p12 = scmp.lt.s32.totalorder %s593_s8, %s593_s8 }
 0x145   :  { %p920_p11 = scmp.ne.s32.totalorder %s593_s8, %s919_s18  ;;  %p925_p13 = scmp.lt.s32.totalorder %s919_s18, %s919_s18 }
 0x146   :  { %763 = vmatpush3.bf16.msra.mxu1 %v810_v53 }
 0x147   :  { %p926_p0 = por %p925_p13, %p924_p12 }
 0x149   :  { %p927_p1 = pnand %p926_p0, %p920_p11 }
 0x1e9   :  { %v330_v42 = vpop.f32.mrf.mxu1 }
 0x1ea   :  { %v331_v44 = vadd.f32 %v616_v41, %v330_v42 }
 0x1eb   :  { %v726_v43 = vpop.f32.mrf.mxu1 }
 0x1ec   :  { %v337_v48 = vmax.f32 %v331_v44, 0.0 }
 0x1ed   :  { %v333_v45 = vpop.f32.mrf.mxu1 }
 0x1ee   :  { %v334_v46 = vadd.f32 %v616_v41, %v333_v45 }
 0x1ef   :  { %v727_v47 = vpop.f32.mrf.mxu1 }
 0x1f0   :  { %v338_v49 = vmax.f32 %v334_v46, 0.0 }
 0x1f2   :  { %v339_v50 = vpack.c.bf16 %v338_v49, %v337_v48 }
 0x1f4   :  { %745 = vmatmul.mubr.bf16.vlgmr.msra.gmra.mxu0 %v339_v50 }
 0x2b4   :  { %v445_v55 = vpop.f32.mrf.mxu0 }
 0x2b5   :  { %v446_v57 = vadd.f32 %v625_v54, %v445_v55 }
 0x2b6   :  { %v746_v56 = vpop.f32.mrf.mxu0 }
 0x2b7   :  { %v452_v61 = vmax.f32 %v446_v57, 0.0 }
 0x2b8   :  { %v448_v58 = vpop.f32.mrf.mxu0 }
 0x2b9   :  { %v449_v59 = vadd.f32 %v625_v54, %v448_v58 }
 0x2ba   :  { %v747_v60 = vpop.f32.mrf.mxu0 }
 0x2bb   :  { %v453_v62 = vmax.f32 %v449_v59, 0.0 }
 0x2bd   :  { %v454_v63 = vpack.c.bf16 %v453_v62, %v452_v61 }
 0x2bf   :  { %765 = vmatmul.mubr.bf16.vlgmr.msra.gmra.mxu1 %v454_v63 }
 0x37f   :  { %v560_v1 = vpop.f32.mrf.mxu1 }
 0x380   :  { %v561_v2 = vadd.f32 %v634_v0, %v560_v1 }
 0x381   :  { %v766_v3 = vpop.f32.mrf.mxu1 }
 0x382   :  { %v567_v4 = vsub.f32 0.0, %v561_v2 }
 0x383   :  { %v563_v5 = vpop.f32.mrf.mxu1 }
 0x384   :  { %v569_v6 = vmul.f32 1.442695, %v567_v4  ;;  %v564_v7 = vadd.f32 %v634_v0, %v563_v5 }
 0x385   :  { %v767_v8 = vpop.f32.mrf.mxu1 }
 0x386   :  { %811 = vpow2.f32 %v569_v6  ;;  %v568_v9 = vsub.f32 0.0, %v564_v7 }
 0x388   :  { %v571_v10 = vmul.f32 1.442695, %v568_v9 }
 0x38a   :  { %813 = vpow2.f32 %v571_v10 }
 0x393   :  { %v812_v11 = vpop.eup %811 }
 0x394   :  { %v573_v12 = vadd.f32 1.0, %v812_v11 }
 0x396   :  { %815 = vrcp.f32 %v573_v12 }
 0x397   :  { %v814_v13 = vpop.eup %813 }
 0x398   :  { %v574_v14 = vadd.f32 1.0, %v814_v13 }
 0x39a   :  { %817 = vrcp.f32 %v574_v14 }
 0x3a3   :  { %v816_v15 = vpop.eup %815 }
 0x3a7   :  { %v818_v16 = vpop.eup %817 }
 0x3a8   :  { %v650_v17 = vpack.c.bf16 %v818_v16, %v816_v15 }
 0x3aa   :  { %651 = vst [vmem:[#allocation11] sm:$0xff] %v650_v17  }
 0x3ab   :  { %930 = shalt.err (!%p927_p1)
}
 0x3ac   :  { %598 = dma.vmem_to_hbm [thread:$0]  %s593_s8, 128, %s1104_s9, [#allocation4], %s949_s14, %s949_s14, %s950_s15  }
 0x3ad   :  { %945 = dma.done.wait [#allocation4], 128  }
 0x3ae   :  { %946 = vsyncadd [#allocation4], 4294967168 }
 0x3af   :  { %602 = vsyncpa [#allocation3], 1 }
 0x3b0   :  { %603 = vsyncpa [#allocation6], 1 }
 0x3b1   :  { %604 = vsyncpa [#allocation9], 1 }
 0x3b2   :  { %605 = vsyncpa [#allocation4], 1 }

</bundles_post_ra>
